<compile_context>
chip_gen: v5e
topology: v5e:2x2
jax: 0.10.0
libtpu: 0.0.40
codegen_flags: <defaults>
</compile_context>

<pallas_src>
import functools

import jax
import jax.numpy as jnp
from jax.experimental import pallas as pl
from jax.experimental.pallas import tpu as pltpu

_EPS = 1e-8


def _pixelnorm_kernel(x_ref, o_ref, *, inv_c):
    # x_ref / o_ref: (BN, C, TILE_HW) block.
    x = x_ref[...].astype(jnp.float32)
    # Sum of squares over the channel axis; fold 1/C into the rsqrt argument.
    sum_sq = jnp.sum(x * x, axis=1, keepdims=True)        # VPU adds
    inv = jax.lax.rsqrt(sum_sq * inv_c + _EPS)             # EUP rsqrt (free slot)
    o_ref[...] = (x * inv).astype(o_ref.dtype)


def _vmem_capacity_bytes():
    """Generation-aware physical VMEM capacity; conservative fallback."""
    try:
        return int(pltpu.get_tpu_info().vmem_capacity_bytes)
    except Exception:
        return 64 * 1024 * 1024  # v7x per-TensorCore physical VMEM (smallest)


def _choose_tiles(N, C, HW, itemsize, budget_bytes):
    """Pick (BN, TILE_HW) so the per-block working set fits `budget_bytes`.

    Working-set bytes per block element:
      DMA buffers : (in + out) * double-buffer * itemsize = 4 * itemsize
      f32 temps   : upcast copy + result                  = 8
    """
    per_elem = 4 * itemsize + 8
    max_block_elems = max(budget_bytes // per_elem, 1)

    if HW > 128:
        tile_hw = (max_block_elems // C) // 128 * 128
        tile_hw = max(128, tile_hw)  # floor; vmem_limit is derived from the block
        if tile_hw < HW:
            # Spatial axis tiled (multiple of 128; trailing block is masked,
            # which is safe because the reduction is purely along C).
            return 1, tile_hw
        tile_hw = HW  # whole spatial extent in one lane-dense block
    else:
        tile_hw = HW  # full (small) spatial extent; block batch instead

    # Whole spatial extent fits -> also block the batch axis to amortize the
    # per-grid-step overhead on small-HW layers.
    bn = max(1, max_block_elems // (C * tile_hw))
    if N >= 4:
        # Keep >= ~4 grid steps so v7x megacore sharding + pipelining survive.
        bn = min(bn, max(1, N // 4))
    bn = min(bn, N)
    return bn, tile_hw


def _vmem_limit_bytes(block_elems, itemsize, capacity):
    dma_bytes = 4 * itemsize * block_elems   # in + out, double-buffered
    temp_bytes = 8 * block_elems             # f32 intermediates inside kernel
    need = dma_bytes + temp_bytes
    limit = need + need // 2 + (4 << 20)     # 50% + 4 MiB headroom (compiler scratch)
    limit = max(limit, 16 << 20)             # never below the v5e default
    return min(limit, capacity)


def pixelwise_normalization(x):
    """x: (N, C, H, W) -> (N, C, H, W), same dtype."""
    N, C, H, W = x.shape
    HW = H * W
    x3 = x.reshape(N, C, HW)

    itemsize = jnp.dtype(x.dtype).itemsize
    capacity = _vmem_capacity_bytes()
    # Per-block working-set budget: <= 70% of physical VMEM, capped at 48 MiB
    # (v5e/v6e: 128 MiB physical -> 48 MiB; v7x: 64 MiB -> ~44 MiB).
    budget = min(48 << 20, int(0.70 * capacity))

    bn, tile_hw = _choose_tiles(N, C, HW, itemsize, budget)
    grid = (pl.cdiv(N, bn), pl.cdiv(HW, tile_hw))

    block_elems = bn * C * tile_hw
    vmem_limit = _vmem_limit_bytes(block_elems, itemsize, capacity)

    # Advisory scheduling hint for XLA around this bandwidth-bound call.
    cost = pl.CostEstimate(
        flops=3 * N * C * HW,
        transcendentals=N * HW,
        bytes_accessed=2 * N * C * HW * itemsize,
    )

    kernel = functools.partial(_pixelnorm_kernel, inv_c=1.0 / C)

    out = pl.pallas_call(
        kernel,
        out_shape=jax.ShapeDtypeStruct((N, C, HW), x.dtype),
        grid=grid,
        in_specs=[pl.BlockSpec((bn, C, tile_hw), lambda n, t: (n, 0, t))],
        out_specs=pl.BlockSpec((bn, C, tile_hw), lambda n, t: (n, 0, t)),
        compiler_params=pltpu.CompilerParams(
            dimension_semantics=("parallel", "parallel"),
            vmem_limit_bytes=int(vmem_limit),
        ),
        cost_estimate=cost,
    )(x3)

    return out.reshape(N, C, H, W)


def _reference(x):
    x = x.astype(jnp.float32)
    return x / jnp.sqrt(jnp.mean(x * x, axis=1, keepdims=True) + 1e-8)


if __name__ == "__main__":
    key = jax.random.PRNGKey(0)
    N, C, H, W = 2, 4, 16, 16
    x = jax.random.normal(key, (N, C, H, W), dtype=jnp.float32)

    y = pixelwise_normalization(x)
    y = jax.block_until_ready(y)

    y_ref = _reference(x)
    assert y.shape == (N, C, H, W)
    assert y.dtype == x.dtype
    assert jnp.allclose(y, y_ref, atol=1e-5, rtol=1e-5), "mismatch vs reference"

    print("KERNEL_OK")
</pallas_src>

<mosaic_0001>
module attributes {stable_mosaic.version = 11 : i64} {
  func.func @_pixelnorm_kernel(%arg0: i32, %arg1: i32, %arg2: memref<2x4x256xf32, #tpu.memory_space<vmem>>, %arg3: memref<2x4x256xf32, #tpu.memory_space<vmem>>) attributes {dimension_semantics = [#tpu.dimension_semantics<parallel>, #tpu.dimension_semantics<parallel>], iteration_bounds = array<i64: 1, 1>, scalar_prefetch = 0 : i64, scratch_operands = 0 : i64, tpu.core_type = #tpu.core_type<tc>, window_params = [{transform_indices = @transform_0, window_bounds = array<i64: 2, 4, 256>}, {transform_indices = @transform_1, window_bounds = array<i64: 2, 4, 256>}]} {
    %c0 = arith.constant 0 : index
    %c0_0 = arith.constant 0 : index
    %c0_1 = arith.constant 0 : index
    %0 = vector.load %arg2[%c0, %c0_0, %c0_1] : memref<2x4x256xf32, #tpu.memory_space<vmem>>, vector<2x4x256xf32>
    %1 = arith.mulf %0, %0 : vector<2x4x256xf32>
    %cst = arith.constant dense<0.000000e+00> : vector<2x256xf32>
    %2 = vector.multi_reduction <add>, %1, %cst [1] : vector<2x4x256xf32> to vector<2x256xf32>
    %3 = vector.shape_cast %2 : vector<2x256xf32> to vector<2x1x256xf32>
    %cst_2 = arith.constant 2.500000e-01 : f32
    %4 = vector.broadcast %cst_2 : f32 to vector<2x1x256xf32>
    %5 = arith.mulf %3, %4 : vector<2x1x256xf32>
    %cst_3 = arith.constant 9.99999993E-9 : f32
    %6 = vector.broadcast %cst_3 : f32 to vector<2x1x256xf32>
    %7 = arith.addf %5, %6 : vector<2x1x256xf32>
    %8 = math.rsqrt %7 : vector<2x1x256xf32>
    %9 = vector.broadcast %8 : vector<2x1x256xf32> to vector<2x4x256xf32>
    %10 = arith.mulf %0, %9 : vector<2x4x256xf32>
    %c0_4 = arith.constant 0 : index
    %c0_5 = arith.constant 0 : index
    %c0_6 = arith.constant 0 : index
    %11 = vector.load %arg3[%c0_4, %c0_5, %c0_6] : memref<2x4x256xf32, #tpu.memory_space<vmem>>, vector<2x4x256xf32>
    tpu.vector_store %arg3[%c0_4, %c0_5, %c0_6], %10 {strides = array<i32>} : memref<2x4x256xf32, #tpu.memory_space<vmem>>, vector<2x4x256xf32>,
    return
  }
  func.func @transform_0(%arg0: i32, %arg1: i32) -> (i32, i32, i32) {
    %c0_i32 = arith.constant 0 : i32
    %c0_i32_0 = arith.constant 0 : i32
    return %arg0, %c0_i32, %arg1 : i32, i32, i32
  }
  func.func @transform_1(%arg0: i32, %arg1: i32) -> (i32, i32, i32) {
    %c0_i32 = arith.constant 0 : i32
    %c0_i32_0 = arith.constant 0 : i32
    return %arg0, %c0_i32, %arg1 : i32, i32, i32
  }
}

</mosaic_0001>

<bundles_post_ra>
// kernel: tpu_custom_call.1
= control target key start
LH: loop header
LB: loop body
LE: loop exit
PB: predicated region body
PF: predicated region fallthrough
CT: control target
= control target key end

     0   :  { %6 = vsyncpa [#allocation3], 0  ;;  %s258_s0 = inlined_call_operand.hbm [shape: f32[2,4,256], index: 0, kind: input, shape index: {}]   ;;  %s259_s1 = inlined_call_operand.hbm [shape: f32[2,4,256], index: 1, kind: output, shape index: {}]  }
   0x1   :  { %7 = vsyncpa [#allocation4], 0  ;;  %s12_s8 = sshll.u32 %s258_s0, 4  ;;  %s216_s9 = smov [#allocation2]   ;;  %s13_s8 = int_to_ptr.hbm [resolvable:$true] %s12_s8 }
   0x2   :  { %s14_s10 = sshll.u32 %s216_s9, 4  ;;  %s217_s11 = smov 128   ;;  %s15_s10 = int_to_ptr.vmem [resolvable:$true] %s14_s10 }
   0x3   :  { %s218_s12 = smov 8  }
   0x4   :  { %20 = dma.hbm_to_vmem [thread:$0]  %s13_s8, 256, %s15_s10, [#allocation3], %s217_s11, %s217_s11, %s218_s12  }
   0x5   :  { %212 = dma.done.wait [#allocation3], 256  }
   0x6   :  { %213 = vsyncadd [#allocation3], 4294967040  ;;  %v236_v0 = vld [vmem:[#allocation2] sm:$0xff]  ;;  %v238_v1 = vld [vmem:[#allocation2 + $0x8] sm:$0xff]  ;;  %vm42_vm0 = vcmask 1043456   ;;  %s219_s0 = smov [#allocation5]  }
   0x7   :  { %v27_v2 = vmul.f32 %v236_v0, %v236_v0  ;;  %v28_v3 = vmul.f32 %v238_v1, %v238_v1  ;;  %s137_s13 = sshll.u32 %s219_s0, 4  ;;  %s139_s16 = sshll.u32 %s259_s1, 4  ;;  %s138_s13 = int_to_ptr.vmem [resolvable:$true] %s137_s13  ;;  %s140_s16 = int_to_ptr.hbm [resolvable:$true] %s139_s16 }
   0x9   :  { %31 = vst [vmem:[#allocation1] ss:$2 sm:$0xff] %v27_v2 }
   0xa   :  { %35 = vst [vmem:[#allocation1 + $0x10] ss:$2 sm:$0xff] %v28_v3 }
  0x10   :  { %v32_v4 = vld.sshfl [vmem:[#allocation1] sm:$0xff pattern:$0x75316420]  ;;  %v33_v5 = vld.sshfl [vmem:[#allocation1 + $0x8] sm:$0xff pattern:$0x75316420] }
  0x11   :  { %v37_v6 = vld.sshfl [vmem:[#allocation1 + $0x18] sm:$0xff pattern:$0x75316420]  ;;  %v43_v7 = vsel %vm42_vm0, %v32_v4, 0.0  ;;  %v50_v8 = vsel %vm42_vm0, %v33_v5, 0.0 }
  0x12   :  { %v44_v9 = vrot.slane %v43_v7, 4  ;;  %v51_v10 = vrot.slane %v50_v8, 4  ;;  %v64_v11 = vsel %vm42_vm0, %v37_v6, 0.0  ;;  %v36_v12 = vld.sshfl [vmem:[#allocation1 + $0x10] sm:$0xff pattern:$0x75316420] }
  0x13   :  { %v65_v13 = vrot.slane %v64_v11, 4  ;;  %v57_v14 = vsel %vm42_vm0, %v36_v12, 0.0 }
  0x14   :  { %v45_v15 = vadd.f32 %v44_v9, %v43_v7  ;;  %v52_v16 = vadd.f32 %v51_v10, %v50_v8  ;;  %v58_v17 = vrot.slane %v57_v14, 4 }
  0x15   :  { %v66_v18 = vadd.f32 %v65_v13, %v64_v11 }
  0x16   :  { %v46_v19 = vrot.slane %v45_v15, 2  ;;  %v53_v20 = vrot.slane %v52_v16, 2  ;;  %v59_v21 = vadd.f32 %v58_v17, %v57_v14 }
  0x17   :  { %v67_v22 = vrot.slane %v66_v18, 2 }
  0x18   :  { %v47_v23 = vadd.f32 %v46_v19, %v45_v15  ;;  %v54_v24 = vadd.f32 %v53_v20, %v52_v16  ;;  %v60_v25 = vrot.slane %v59_v21, 2 }
  0x19   :  { %v68_v26 = vadd.f32 %v67_v22, %v66_v18 }
  0x1a   :  { %v48_v27 = vrot.slane %v47_v23, 1  ;;  %v55_v28 = vrot.slane %v54_v24, 1  ;;  %v61_v29 = vadd.f32 %v60_v25, %v59_v21 }
  0x1b   :  { %v69_v30 = vrot.slane %v68_v26, 1 }
  0x1c   :  { %v49_v31 = vadd.f32 %v48_v27, %v47_v23  ;;  %v56_v32 = vadd.f32 %v55_v28, %v54_v24  ;;  %v62_v33 = vrot.slane %v61_v29, 1 }
  0x1d   :  { %v70_v34 = vadd.f32 %v69_v30, %v68_v26 }
  0x1e   :  { %v71_v35 = vmul.f32 0.25, %v49_v31  ;;  %v72_v36 = vmul.f32 0.25, %v56_v32  ;;  %v63_v37 = vadd.f32 %v62_v33, %v61_v29 }
  0x1f   :  { %v74_v38 = vmul.f32 0.25, %v70_v34 }
  0x20   :  { %v75_v39 = vadd.f32 1e-08, %v71_v35  ;;  %v76_v40 = vadd.f32 1e-08, %v72_v36  ;;  %v73_v41 = vmul.f32 0.25, %v63_v37 }
  0x21   :  { %v78_v42 = vadd.f32 1e-08, %v74_v38 }
  0x22   :  { %156 = vrsqrt.f32 %v75_v39  ;;  %v77_v43 = vadd.f32 1e-08, %v73_v41  ;;  %vm95_vm3 = vweird.f32 %v76_v40  ;;  %vm85_vm5 = vweird.f32 %v75_v39 }
  0x23   :  { %158 = vrsqrt.f32 %v76_v40  ;;  %vm115_vm7 = vweird.f32 %v78_v42 }
  0x24   :  { %160 = vrsqrt.f32 %v77_v43  ;;  %vm105_vm11 = vweird.f32 %v77_v43 }
  0x25   :  { %162 = vrsqrt.f32 %v78_v42 }
  0x28   :  { %v157_v44 = vpop.eup %156 }
  0x29   :  { %v159_v45 = vpop.eup %158  ;;  %v80_v46 = vmul.f32 %v157_v44, %v75_v39  ;;  %vm86_vm2 = vweird.f32 %v157_v44 }
  0x2a   :  { %v161_v47 = vpop.eup %160  ;;  %v90_v48 = vmul.f32 %v159_v45, %v76_v40  ;;  %vm96_vm1 = vweird.f32 %v159_v45  ;;  %vm87_vm8 = vmor %vm85_vm5, %vm86_vm2 }
  0x2b   :  { %v163_v49 = vpop.eup %162  ;;  %v81_v50 = vmul.f32 %v157_v44, %v80_v46  ;;  %v100_v51 = vmul.f32 %v161_v47, %v77_v43  ;;  %vm97_vm6 = vmor %vm95_vm3, %vm96_vm1  ;;  %vm106_vm9 = vweird.f32 %v161_v47 }
  0x2c   :  { %v91_v52 = vmul.f32 %v159_v45, %v90_v48  ;;  %v110_v53 = vmul.f32 %v163_v49, %v78_v42  ;;  %vm116_vm4 = vweird.f32 %v163_v49  ;;  %vm107_vm12 = vmor %vm105_vm11, %vm106_vm9 }
  0x2d   :  { %v82_v54 = vmul.f32 0.5, %v81_v50  ;;  %v101_v55 = vmul.f32 %v161_v47, %v100_v51  ;;  %vm117_vm10 = vmor %vm115_vm7, %vm116_vm4 }
  0x2e   :  { %v92_v56 = vmul.f32 0.5, %v91_v52  ;;  %v111_v57 = vmul.f32 %v163_v49, %v110_v53 }
  0x2f   :  { %v83_v58 = vsub.f32 1.5, %v82_v54  ;;  %v102_v59 = vmul.f32 0.5, %v101_v55 }
  0x30   :  { %v93_v60 = vsub.f32 1.5, %v92_v56  ;;  %v112_v61 = vmul.f32 0.5, %v111_v57 }
  0x31   :  { %v103_v62 = vsub.f32 1.5, %v102_v59  ;;  %v84_v63 = vmul.f32 %v157_v44, %v83_v58 }
  0x32   :  { %v94_v2 = vmul.f32 %v159_v45, %v93_v60  ;;  %v113_v3 = vsub.f32 1.5, %v112_v61 }
  0x33   :  { %v104_v5 = vmul.f32 %v161_v47, %v103_v62  ;;  %v88_v8 = vsel %vm87_vm8, %v157_v44, %v84_v63 }
  0x34   :  { %v98_v4 = vsel %vm97_vm6, %v159_v45, %v94_v2  ;;  %v114_v6 = vmul.f32 %v163_v49, %v113_v3 }
  0x35   :  { %v123_v7 = vrot.slane %v98_v4, 4  ;;  %v108_v13 = vsel %vm107_vm12, %v161_v47, %v104_v5 }
  0x36   :  { %v118_v9 = vsel %vm117_vm10, %v163_v49, %v114_v6 }
  0x37   :  { %v125_v10 = vsel %vm42_vm0, %v88_v8, %v123_v7  ;;  %v124_v11 = vrot.slane %v118_v9, 4 }
  0x38   :  { %v129_v12 = vmul.f32 %v125_v10, %v236_v0 }
  0x39   :  { %v126_v14 = vsel %vm42_vm0, %v108_v13, %v124_v11 }
  0x3a   :  { %131 = vst [vmem:[#allocation5] sm:$0xff] %v129_v12  ;;  %v130_v15 = vmul.f32 %v126_v14, %v238_v1 }
  0x3c   :  { %132 = vst [vmem:[#allocation5 + $0x8] sm:$0xff] %v130_v15 }
  0x3d   :  { %145 = dma.vmem_to_hbm [thread:$0]  %s138_s13, 256, %s140_s16, [#allocation4], %s217_s11, %s217_s11, %s218_s12  }
  0x3e   :  { %214 = dma.done.wait [#allocation4], 256  }
  0x3f   :  { %215 = vsyncadd [#allocation4], 4294967040 }
  0x40   :  { %150 = vsyncpa [#allocation3], 1 }
  0x41   :  { %151 = vsyncpa [#allocation4], 1 }

</bundles_post_ra>
